<compile_context>
chip_gen: v7x
topology: tpu7x:2x2x1
jax: 0.10.0
libtpu: 0.0.40
codegen_flags: <defaults>
</compile_context>

<pallas_src>
import functools

import jax
import jax.numpy as jnp
from jax import lax
from jax.experimental import pallas as pl
from jax.experimental.pallas import tpu as pltpu


def _round_up(x, m):
    return ((x + m - 1) // m) * m


def _cdiv(a, b):
    return -(-a // b)


# ---------------------------------------------------------------------------
# Kernel: whole MLP forward on one (row-tile x padded-features) VMEM block.
# Ref order: x, (w, b) per layer, out.  Matmuls hit the MXU in matmul_dtype with
# f32 accumulation; bias/ReLU/LayerNorm run on the VPU/EUP in f32.
# ---------------------------------------------------------------------------
def _mlp_kernel(*refs, num_layers, layer_normalized, eps, real_out_dim, matmul_dtype):
    x_ref = refs[0]
    o_ref = refs[-1]
    wb_refs = refs[1:-1]  # num_layers pairs of (w_ref, b_ref)

    h = x_ref[...]  # already in matmul_dtype (bf16 by default) -> no downcast here
    for layer in range(num_layers):
        w = wb_refs[2 * layer][...]          # matmul_dtype, VMEM-resident across steps
        b = wb_refs[2 * layer + 1][...]      # f32
        acc = jnp.dot(h.astype(matmul_dtype), w, preferred_element_type=jnp.float32)
        h = acc + b                          # f32 from here on
        if layer < num_layers - 1:           # ReLU after every hidden Linear, not the last
            h = jnp.maximum(h, 0.0)

    if layer_normalized:
        # Padded output lanes are exactly zero (zero-padded weight columns and bias),
        # so unmasked sums over the padded row equal sums over the real features.
        inv_n = 1.0 / real_out_dim
        mean = jnp.sum(h, axis=-1, keepdims=True) * inv_n
        mean_sq = jnp.sum(h * h, axis=-1, keepdims=True) * inv_n
        var = jnp.maximum(mean_sq - mean * mean, 0.0)
        h = (h - mean) * lax.rsqrt(var + eps)

    o_ref[...] = h.astype(o_ref.dtype)


# ---------------------------------------------------------------------------
# Wrapper: pads feature dims to multiples of 128, tiles the row axis, builds
# BlockSpecs and calls pallas_call.
# ---------------------------------------------------------------------------
def mlp_pallas(x, weights, biases, *, layer_normalized=True, eps=1e-5,
               row_tile=None, matmul_dtype=jnp.bfloat16):
    """x: [..., input_dim]; weights: [in,out] per layer; biases: [1,out] per layer."""
    num_layers = len(weights)
    in_dim = weights[0].shape[0]
    out_dim = weights[-1].shape[1]
    assert x.shape[-1] == in_dim

    # Feature width of each activation (input + every layer output), padded to 128.
    # 128-lane padding is MXU-aligned on v5e/v6e/v7x and gives lane-dense vst on the output.
    # TODO(synk): pad to 256 on v6e/v7x when real dims >= 256 to fully feed the 256x256 MXU.
    feat = [in_dim] + [w.shape[1] for w in weights]
    feat_p = [_round_up(d, 128) for d in feat]

    lead = x.shape[:-1]
    rows = 1
    for d in lead:
        rows *= d

    out_dtype = x.dtype
    mm_bytes = jnp.dtype(matmul_dtype).itemsize
    out_bytes = jnp.dtype(out_dtype).itemsize

    # Activations travel HBM->VMEM in the matmul dtype (half the bytes for bf16).
    x2d = x.reshape(rows, in_dim).astype(matmul_dtype)

    # Zero-pad weights/biases once; weights in matmul_dtype, biases stay f32 (epilogue math).
    weights_p, biases_p = [], []
    for li, (w, b) in enumerate(zip(weights, biases)):
        wp = jnp.zeros((feat_p[li], feat_p[li + 1]), jnp.float32)
        wp = wp.at[: w.shape[0], : w.shape[1]].set(w)
        bp = jnp.zeros((1, feat_p[li + 1]), jnp.float32)
        bp = bp.at[:, : b.shape[-1]].set(b.reshape(1, -1))
        weights_p.append(wp.astype(matmul_dtype))
        biases_p.append(bp)

    w_bytes = sum(int(w.size) * w.dtype.itemsize for w in weights_p)
    b_bytes = sum(int(b.size) * b.dtype.itemsize for b in biases_p)

    # Generation-aware VMEM budgets: v5e/v6e have 128 MiB per TC, v7x has 64 MiB.
    try:
        vmem_cap = int(pltpu.get_tpu_info().vmem_capacity_bytes)
    except Exception:
        vmem_cap = 64 * 1024 * 1024  # conservative default (v7x-sized)
    if vmem_cap >= 100 * 1024 * 1024:      # v5e / v6e
        work_budget = 96 * 1024 * 1024
        limit_cap = 112 * 1024 * 1024
        default_row_tile = 2048
    else:                                   # v7x
        work_budget = 44 * 1024 * 1024
        limit_cap = 56 * 1024 * 1024
        default_row_tile = 1024
    if row_tile is None:
        row_tile = default_row_tile

    if w_bytes + b_bytes > work_budget:
        # TODO(synk): stream weights layer-by-layer with a manual double-buffered
        # make_async_copy (memory_space=pl.ANY) for MLPs whose weights exceed VMEM.
        raise ValueError("MLP weights exceed the VMEM budget; weight streaming not implemented")

    def vmem_est(t, wb_buffers):
        est = 2 * t * feat_p[0] * mm_bytes        # double-buffered x blocks (matmul dtype)
        est += 2 * t * feat_p[-1] * out_bytes     # double-buffered out blocks
        est += wb_buffers * (w_bytes + b_bytes)   # resident weights/biases (1x or 2x buffered)
        est += 3 * t * max(feat_p) * 4            # f32 activation temporaries headroom
        return est

    # Balanced row tiling: minimal padding waste, and >=2 grid steps whenever rows allow
    # so "parallel" actually shards across v7x's two TensorCores.
    num_tiles = _cdiv(rows, row_tile)
    if rows >= 16:
        num_tiles = max(num_tiles, 2)
    tm = _round_up(_cdiv(rows, num_tiles), 8)
    while tm > 8 and vmem_est(tm, 1) > work_budget:
        tm = _round_up(max(8, tm // 2), 8)
    num_tiles = _cdiv(rows, tm)
    rows_p = num_tiles * tm

    x2d = jnp.pad(x2d, ((0, rows_p - rows), (0, feat_p[0] - in_dim)))

    kernel = functools.partial(
        _mlp_kernel,
        num_layers=num_layers,
        layer_normalized=layer_normalized,
        eps=eps,
        real_out_dim=out_dim,
        matmul_dtype=matmul_dtype,
    )

    args = [x2d]
    for wp, bp in zip(weights_p, biases_p):
        args.append(wp)
        args.append(bp)

    def run(single_buffer_weights):
        wb_kwargs = {"pipeline_mode": pl.Buffered(1)} if single_buffer_weights else {}
        in_specs = [pl.BlockSpec((tm, feat_p[0]), lambda i: (i, 0))]
        for wp, bp in zip(weights_p, biases_p):
            # Grid-invariant -> stays VMEM-resident across all row tiles.
            in_specs.append(pl.BlockSpec(wp.shape, lambda i: (0, 0), **wb_kwargs))
            in_specs.append(pl.BlockSpec(bp.shape, lambda i: (0, 0), **wb_kwargs))
        est = vmem_est(tm, 1 if single_buffer_weights else 2)
        vmem_limit = int(min(limit_cap, max(32 * 1024 * 1024, 2 * est)))
        return pl.pallas_call(
            kernel,
            out_shape=jax.ShapeDtypeStruct((rows_p, feat_p[-1]), out_dtype),
            grid=(num_tiles,),
            in_specs=in_specs,
            out_specs=pl.BlockSpec((tm, feat_p[-1]), lambda i: (i, 0)),
            compiler_params=pltpu.CompilerParams(
                dimension_semantics=("parallel",),  # megacore sharding on v7x
                vmem_limit_bytes=vmem_limit,
            ),
        )(*args)

    try:
        out2d = run(True)      # single-buffered weights (halves weight VMEM residency)
    except Exception:
        out2d = run(False)     # fallback: default double-buffering if Buffered(1) rejected

    out = out2d[:rows, :out_dim]
    return out.reshape(*lead, out_dim)


# ---------------------------------------------------------------------------
# Deterministic parameter construction (mirrors torch.nn.Linear shapes).
# torch stores W as [out, in] and computes x @ W^T + b; we pre-transpose to
# [in, out] so the kernel does a plain x @ W + b.
# ---------------------------------------------------------------------------
def make_mlp_params(key, input_dim, latent_dim, output_dim, hidden_layers):
    dims = []
    for layer in range(hidden_layers):
        dims.append((input_dim if layer == 0 else latent_dim, latent_dim))
    dims.append((latent_dim, output_dim))

    weights, biases = [], []
    for (fan_in, fan_out) in dims:
        key, kw, kb = jax.random.split(key, 3)
        bound = 1.0 / (fan_in ** 0.5)  # torch.nn.Linear default uniform init range
        w = jax.random.uniform(kw, (fan_in, fan_out), jnp.float32, -bound, bound)
        b = jax.random.uniform(kb, (1, fan_out), jnp.float32, -bound, bound)
        weights.append(w)
        biases.append(b)
    return weights, biases


def mlp_reference(x, weights, biases, *, layer_normalized=True, eps=1e-5,
                  matmul_dtype=jnp.float32):
    h = x.astype(jnp.float32)
    n = len(weights)
    for i, (w, b) in enumerate(zip(weights, biases)):
        h = jnp.dot(h.astype(matmul_dtype), w.astype(matmul_dtype),
                    preferred_element_type=jnp.float32) + b.reshape(-1).astype(jnp.float32)
        if i < n - 1:
            h = jnp.maximum(h, 0.0)
    if layer_normalized:
        mean = jnp.mean(h, axis=-1, keepdims=True)
        var = jnp.mean((h - mean) ** 2, axis=-1, keepdims=True)
        h = (h - mean) / jnp.sqrt(var + eps)
    return h


if __name__ == "__main__":
    # Module config (small, consistent with the torch module's __init__)
    input_dim, latent_dim, output_dim, hidden_layers = 16, 32, 16, 2

    key = jax.random.PRNGKey(0)
    key, kx = jax.random.split(key)

    # x: [batch=2, seq=8, input_dim=16]  (any leading dims; features last)
    x = jax.random.normal(kx, (2, 8, input_dim), jnp.float32)

    weights, biases = make_mlp_params(key, input_dim, latent_dim, output_dim, hidden_layers)

    out = mlp_pallas(x, weights, biases, layer_normalized=True)
    out = jax.block_until_ready(out)
    assert out.shape == (2, 8, output_dim), out.shape

    # Matched-precision reference (bf16 matmul inputs, f32 accumulation) -> tight check.
    ref_bf16 = mlp_reference(x, weights, biases, layer_normalized=True,
                             matmul_dtype=jnp.bfloat16)
    assert jnp.allclose(out, ref_bf16, atol=1e-2, rtol=1e-2), \
        "mismatch vs. matched-precision reference"

    # Full f32 reference (exact module semantics) -> loose check covering bf16 rounding.
    ref_f32 = mlp_reference(x, weights, biases, layer_normalized=True,
                            matmul_dtype=jnp.float32)
    assert jnp.allclose(out, ref_f32, atol=5e-2, rtol=5e-2), "mismatch vs. f32 reference"

    print("KERNEL_OK")
</pallas_src>

<mosaic_0001>
module attributes {stable_mosaic.version = 11 : i64} {
  func.func @_mlp_kernel(%arg0: i32, %arg1: memref<8x128xbf16, #tpu.memory_space<vmem>>, %arg2: memref<128x128xbf16, #tpu.memory_space<vmem>>, %arg3: memref<1x128xf32, #tpu.memory_space<vmem>>, %arg4: memref<128x128xbf16, #tpu.memory_space<vmem>>, %arg5: memref<1x128xf32, #tpu.memory_space<vmem>>, %arg6: memref<128x128xbf16, #tpu.memory_space<vmem>>, %arg7: memref<1x128xf32, #tpu.memory_space<vmem>>, %arg8: memref<8x128xf32, #tpu.memory_space<vmem>>) attributes {dimension_semantics = [#tpu.dimension_semantics<parallel>], iteration_bounds = array<i64: 2>, scalar_prefetch = 0 : i64, scratch_operands = 0 : i64, tpu.core_type = #tpu.core_type<tc>, window_params = [{transform_indices = @transform_0, window_bounds = array<i64: 8, 128>}, {pipeline_mode = #tpu.pipeline_mode<synchronous>, transform_indices = @transform_1, window_bounds = array<i64: 128, 128>}, {pipeline_mode = #tpu.pipeline_mode<synchronous>, transform_indices = @transform_2, window_bounds = array<i64: 1, 128>}, {pipeline_mode = #tpu.pipeline_mode<synchronous>, transform_indices = @transform_3, window_bounds = array<i64: 128, 128>}, {pipeline_mode = #tpu.pipeline_mode<synchronous>, transform_indices = @transform_4, window_bounds = array<i64: 1, 128>}, {pipeline_mode = #tpu.pipeline_mode<synchronous>, transform_indices = @transform_5, window_bounds = array<i64: 128, 128>}, {pipeline_mode = #tpu.pipeline_mode<synchronous>, transform_indices = @transform_6, window_bounds = array<i64: 1, 128>}, {transform_indices = @transform_7, window_bounds = array<i64: 8, 128>}]} {
    %c0 = arith.constant 0 : index
    %c0_0 = arith.constant 0 : index
    %0 = vector.load %arg1[%c0, %c0_0] : memref<8x128xbf16, #tpu.memory_space<vmem>>, vector<8x128xbf16>
    %c0_1 = arith.constant 0 : index
    %c0_2 = arith.constant 0 : index
    %1 = vector.load %arg2[%c0_1, %c0_2] : memref<128x128xbf16, #tpu.memory_space<vmem>>, vector<128x128xbf16>
    %c0_3 = arith.constant 0 : index
    %c0_4 = arith.constant 0 : index
    %2 = vector.load %arg3[%c0_3, %c0_4] : memref<1x128xf32, #tpu.memory_space<vmem>>, vector<1x128xf32>
    %cst = arith.constant dense<0.000000e+00> : vector<8x128xf32>
    %3 = tpu.matmul %0, %1, %cst {dimension_numbers = #tpu.dot_dimension_numbers<[1], [0], [0], [1], [0, 0, 1, 1], [], []>} : vector<8x128xbf16>, vector<128x128xbf16>, vector<8x128xf32> -> vector<8x128xf32>
    %4 = vector.broadcast %2 : vector<1x128xf32> to vector<8x128xf32>
    %5 = arith.addf %3, %4 : vector<8x128xf32>
    %cst_5 = arith.constant 0.000000e+00 : f32
    %6 = vector.broadcast %cst_5 : f32 to vector<8x128xf32>
    %7 = arith.maximumf %5, %6 : vector<8x128xf32>
    %c0_6 = arith.constant 0 : index
    %c0_7 = arith.constant 0 : index
    %8 = vector.load %arg4[%c0_6, %c0_7] : memref<128x128xbf16, #tpu.memory_space<vmem>>, vector<128x128xbf16>
    %c0_8 = arith.constant 0 : index
    %c0_9 = arith.constant 0 : index
    %9 = vector.load %arg5[%c0_8, %c0_9] : memref<1x128xf32, #tpu.memory_space<vmem>>, vector<1x128xf32>
    %10 = arith.truncf %7 : vector<8x128xf32> to vector<8x128xbf16>
    %cst_10 = arith.constant dense<0.000000e+00> : vector<8x128xf32>
    %11 = tpu.matmul %10, %8, %cst_10 {dimension_numbers = #tpu.dot_dimension_numbers<[1], [0], [0], [1], [0, 0, 1, 1], [], []>} : vector<8x128xbf16>, vector<128x128xbf16>, vector<8x128xf32> -> vector<8x128xf32>
    %12 = vector.broadcast %9 : vector<1x128xf32> to vector<8x128xf32>
    %13 = arith.addf %11, %12 : vector<8x128xf32>
    %cst_11 = arith.constant 0.000000e+00 : f32
    %14 = vector.broadcast %cst_11 : f32 to vector<8x128xf32>
    %15 = arith.maximumf %13, %14 : vector<8x128xf32>
    %c0_12 = arith.constant 0 : index
    %c0_13 = arith.constant 0 : index
    %16 = vector.load %arg6[%c0_12, %c0_13] : memref<128x128xbf16, #tpu.memory_space<vmem>>, vector<128x128xbf16>
    %c0_14 = arith.constant 0 : index
    %c0_15 = arith.constant 0 : index
    %17 = vector.load %arg7[%c0_14, %c0_15] : memref<1x128xf32, #tpu.memory_space<vmem>>, vector<1x128xf32>
    %18 = arith.truncf %15 : vector<8x128xf32> to vector<8x128xbf16>
    %cst_16 = arith.constant dense<0.000000e+00> : vector<8x128xf32>
    %19 = tpu.matmul %18, %16, %cst_16 {dimension_numbers = #tpu.dot_dimension_numbers<[1], [0], [0], [1], [0, 0, 1, 1], [], []>} : vector<8x128xbf16>, vector<128x128xbf16>, vector<8x128xf32> -> vector<8x128xf32>
    %20 = vector.broadcast %17 : vector<1x128xf32> to vector<8x128xf32>
    %21 = arith.addf %19, %20 : vector<8x128xf32>
    %cst_17 = arith.constant dense<0.000000e+00> : vector<8xf32>
    %22 = vector.multi_reduction <add>, %21, %cst_17 [1] : vector<8x128xf32> to vector<8xf32>
    %23 = vector.shape_cast %22 : vector<8xf32> to vector<8x1xf32>
    %cst_18 = arith.constant 6.250000e-02 : f32
    %24 = vector.broadcast %cst_18 : f32 to vector<8x1xf32>
    %25 = arith.mulf %23, %24 : vector<8x1xf32>
    %26 = arith.mulf %21, %21 : vector<8x128xf32>
    %cst_19 = arith.constant dense<0.000000e+00> : vector<8xf32>
    %27 = vector.multi_reduction <add>, %26, %cst_19 [1] : vector<8x128xf32> to vector<8xf32>
    %28 = vector.shape_cast %27 : vector<8xf32> to vector<8x1xf32>
    %cst_20 = arith.constant 6.250000e-02 : f32
    %29 = vector.broadcast %cst_20 : f32 to vector<8x1xf32>
    %30 = arith.mulf %28, %29 : vector<8x1xf32>
    %31 = arith.mulf %25, %25 : vector<8x1xf32>
    %32 = arith.subf %30, %31 : vector<8x1xf32>
    %cst_21 = arith.constant 0.000000e+00 : f32
    %33 = vector.broadcast %cst_21 : f32 to vector<8x1xf32>
    %34 = arith.maximumf %32, %33 : vector<8x1xf32>
    %35 = vector.broadcast %25 : vector<8x1xf32> to vector<8x128xf32>
    %36 = arith.subf %21, %35 : vector<8x128xf32>
    %cst_22 = arith.constant 9.99999974E-6 : f32
    %37 = vector.broadcast %cst_22 : f32 to vector<8x1xf32>
    %38 = arith.addf %34, %37 : vector<8x1xf32>
    %39 = math.rsqrt %38 : vector<8x1xf32>
    %40 = vector.broadcast %39 : vector<8x1xf32> to vector<8x128xf32>
    %41 = arith.mulf %36, %40 : vector<8x128xf32>
    %c0_23 = arith.constant 0 : index
    %c0_24 = arith.constant 0 : index
    %42 = vector.load %arg8[%c0_23, %c0_24] : memref<8x128xf32, #tpu.memory_space<vmem>>, vector<8x128xf32>
    tpu.vector_store %arg8[%c0_23, %c0_24], %41 {strides = array<i32>} : memref<8x128xf32, #tpu.memory_space<vmem>>, vector<8x128xf32>,
    return
  }
  func.func @transform_0(%arg0: i32) -> (i32, i32) {
    %c0_i32 = arith.constant 0 : i32
    %c0_i32_0 = arith.constant 0 : i32
    return %arg0, %c0_i32 : i32, i32
  }
  func.func @transform_1(%arg0: i32) -> (i32, i32) {
    %c0_i32 = arith.constant 0 : i32
    %c0_i32_0 = arith.constant 0 : i32
    %c0_i32_1 = arith.constant 0 : i32
    return %c0_i32, %c0_i32_0 : i32, i32
  }
  func.func @transform_2(%arg0: i32) -> (i32, i32) {
    %c0_i32 = arith.constant 0 : i32
    %c0_i32_0 = arith.constant 0 : i32
    %c0_i32_1 = arith.constant 0 : i32
    return %c0_i32, %c0_i32_0 : i32, i32
  }
  func.func @transform_3(%arg0: i32) -> (i32, i32) {
    %c0_i32 = arith.constant 0 : i32
    %c0_i32_0 = arith.constant 0 : i32
    %c0_i32_1 = arith.constant 0 : i32
    return %c0_i32, %c0_i32_0 : i32, i32
  }
  func.func @transform_4(%arg0: i32) -> (i32, i32) {
    %c0_i32 = arith.constant 0 : i32
    %c0_i32_0 = arith.constant 0 : i32
    %c0_i32_1 = arith.constant 0 : i32
    return %c0_i32, %c0_i32_0 : i32, i32
  }
  func.func @transform_5(%arg0: i32) -> (i32, i32) {
    %c0_i32 = arith.constant 0 : i32
    %c0_i32_0 = arith.constant 0 : i32
    %c0_i32_1 = arith.constant 0 : i32
    return %c0_i32, %c0_i32_0 : i32, i32
  }
  func.func @transform_6(%arg0: i32) -> (i32, i32) {
    %c0_i32 = arith.constant 0 : i32
    %c0_i32_0 = arith.constant 0 : i32
    %c0_i32_1 = arith.constant 0 : i32
    return %c0_i32, %c0_i32_0 : i32, i32
  }
  func.func @transform_7(%arg0: i32) -> (i32, i32) {
    %c0_i32 = arith.constant 0 : i32
    %c0_i32_0 = arith.constant 0 : i32
    return %arg0, %c0_i32 : i32, i32
  }
}

module attributes {stable_mosaic.version = 11 : i64} {
  func.func @_mlp_kernel(%arg0: i32, %arg1: memref<8x128xbf16, #tpu.memory_space<vmem>>, %arg2: memref<128x128xbf16, #tpu.memory_space<vmem>>, %arg3: memref<1x128xf32, #tpu.memory_space<vmem>>, %arg4: memref<128x128xbf16, #tpu.memory_space<vmem>>, %arg5: memref<1x128xf32, #tpu.memory_space<vmem>>, %arg6: memref<128x128xbf16, #tpu.memory_space<vmem>>, %arg7: memref<1x128xf32, #tpu.memory_space<vmem>>, %arg8: memref<8x128xf32, #tpu.memory_space<vmem>>) attributes {dimension_semantics = [#tpu.dimension_semantics<parallel>], iteration_bounds = array<i64: 2>, scalar_prefetch = 0 : i64, scratch_operands = 0 : i64, tpu.core_type = #tpu.core_type<tc>, window_params = [{transform_indices = @transform_0, window_bounds = array<i64: 8, 128>}, {pipeline_mode = #tpu.pipeline_mode<synchronous>, transform_indices = @transform_1, window_bounds = array<i64: 128, 128>}, {pipeline_mode = #tpu.pipeline_mode<synchronous>, transform_indices = @transform_2, window_bounds = array<i64: 1, 128>}, {pipeline_mode = #tpu.pipeline_mode<synchronous>, transform_indices = @transform_3, window_bounds = array<i64: 128, 128>}, {pipeline_mode = #tpu.pipeline_mode<synchronous>, transform_indices = @transform_4, window_bounds = array<i64: 1, 128>}, {pipeline_mode = #tpu.pipeline_mode<synchronous>, transform_indices = @transform_5, window_bounds = array<i64: 128, 128>}, {pipeline_mode = #tpu.pipeline_mode<synchronous>, transform_indices = @transform_6, window_bounds = array<i64: 1, 128>}, {transform_indices = @transform_7, window_bounds = array<i64: 8, 128>}]} {
    %c0 = arith.constant 0 : index
    %c0_0 = arith.constant 0 : index
    %0 = vector.load %arg1[%c0, %c0_0] : memref<8x128xbf16, #tpu.memory_space<vmem>>, vector<8x128xbf16>
    %c0_1 = arith.constant 0 : index
    %c0_2 = arith.constant 0 : index
    %1 = vector.load %arg2[%c0_1, %c0_2] : memref<128x128xbf16, #tpu.memory_space<vmem>>, vector<128x128xbf16>
    %c0_3 = arith.constant 0 : index
    %c0_4 = arith.constant 0 : index
    %2 = vector.load %arg3[%c0_3, %c0_4] : memref<1x128xf32, #tpu.memory_space<vmem>>, vector<1x128xf32>
    %cst = arith.constant dense<0.000000e+00> : vector<8x128xf32>
    %3 = tpu.matmul %0, %1, %cst {dimension_numbers = #tpu.dot_dimension_numbers<[1], [0], [0], [1], [0, 0, 1, 1], [], []>} : vector<8x128xbf16>, vector<128x128xbf16>, vector<8x128xf32> -> vector<8x128xf32>
    %4 = vector.broadcast %2 : vector<1x128xf32> to vector<8x128xf32>
    %5 = arith.addf %3, %4 : vector<8x128xf32>
    %cst_5 = arith.constant 0.000000e+00 : f32
    %6 = vector.broadcast %cst_5 : f32 to vector<8x128xf32>
    %7 = arith.maximumf %5, %6 : vector<8x128xf32>
    %c0_6 = arith.constant 0 : index
    %c0_7 = arith.constant 0 : index
    %8 = vector.load %arg4[%c0_6, %c0_7] : memref<128x128xbf16, #tpu.memory_space<vmem>>, vector<128x128xbf16>
    %c0_8 = arith.constant 0 : index
    %c0_9 = arith.constant 0 : index
    %9 = vector.load %arg5[%c0_8, %c0_9] : memref<1x128xf32, #tpu.memory_space<vmem>>, vector<1x128xf32>
    %10 = arith.truncf %7 : vector<8x128xf32> to vector<8x128xbf16>
    %cst_10 = arith.constant dense<0.000000e+00> : vector<8x128xf32>
    %11 = tpu.matmul %10, %8, %cst_10 {dimension_numbers = #tpu.dot_dimension_numbers<[1], [0], [0], [1], [0, 0, 1, 1], [], []>} : vector<8x128xbf16>, vector<128x128xbf16>, vector<8x128xf32> -> vector<8x128xf32>
    %12 = vector.broadcast %9 : vector<1x128xf32> to vector<8x128xf32>
    %13 = arith.addf %11, %12 : vector<8x128xf32>
    %cst_11 = arith.constant 0.000000e+00 : f32
    %14 = vector.broadcast %cst_11 : f32 to vector<8x128xf32>
    %15 = arith.maximumf %13, %14 : vector<8x128xf32>
    %c0_12 = arith.constant 0 : index
    %c0_13 = arith.constant 0 : index
    %16 = vector.load %arg6[%c0_12, %c0_13] : memref<128x128xbf16, #tpu.memory_space<vmem>>, vector<128x128xbf16>
    %c0_14 = arith.constant 0 : index
    %c0_15 = arith.constant 0 : index
    %17 = vector.load %arg7[%c0_14, %c0_15] : memref<1x128xf32, #tpu.memory_space<vmem>>, vector<1x128xf32>
    %18 = arith.truncf %15 : vector<8x128xf32> to vector<8x128xbf16>
    %cst_16 = arith.constant dense<0.000000e+00> : vector<8x128xf32>
    %19 = tpu.matmul %18, %16, %cst_16 {dimension_numbers = #tpu.dot_dimension_numbers<[1], [0], [0], [1], [0, 0, 1, 1], [], []>} : vector<8x128xbf16>, vector<128x128xbf16>, vector<8x128xf32> -> vector<8x128xf32>
    %20 = vector.broadcast %17 : vector<1x128xf32> to vector<8x128xf32>
    %21 = arith.addf %19, %20 : vector<8x128xf32>
    %cst_17 = arith.constant dense<0.000000e+00> : vector<8xf32>
    %22 = vector.multi_reduction <add>, %21, %cst_17 [1] : vector<8x128xf32> to vector<8xf32>
    %23 = vector.shape_cast %22 : vector<8xf32> to vector<8x1xf32>
    %cst_18 = arith.constant 6.250000e-02 : f32
    %24 = vector.broadcast %cst_18 : f32 to vector<8x1xf32>
    %25 = arith.mulf %23, %24 : vector<8x1xf32>
    %26 = arith.mulf %21, %21 : vector<8x128xf32>
    %cst_19 = arith.constant dense<0.000000e+00> : vector<8xf32>
    %27 = vector.multi_reduction <add>, %26, %cst_19 [1] : vector<8x128xf32> to vector<8xf32>
    %28 = vector.shape_cast %27 : vector<8xf32> to vector<8x1xf32>
    %cst_20 = arith.constant 6.250000e-02 : f32
    %29 = vector.broadcast %cst_20 : f32 to vector<8x1xf32>
    %30 = arith.mulf %28, %29 : vector<8x1xf32>
    %31 = arith.mulf %25, %25 : vector<8x1xf32>
    %32 = arith.subf %30, %31 : vector<8x1xf32>
    %cst_21 = arith.constant 0.000000e+00 : f32
    %33 = vector.broadcast %cst_21 : f32 to vector<8x1xf32>
    %34 = arith.maximumf %32, %33 : vector<8x1xf32>
    %35 = vector.broadcast %25 : vector<8x1xf32> to vector<8x128xf32>
    %36 = arith.subf %21, %35 : vector<8x128xf32>
    %cst_22 = arith.constant 9.99999974E-6 : f32
    %37 = vector.broadcast %cst_22 : f32 to vector<8x1xf32>
    %38 = arith.addf %34, %37 : vector<8x1xf32>
    %39 = math.rsqrt %38 : vector<8x1xf32>
    %40 = vector.broadcast %39 : vector<8x1xf32> to vector<8x128xf32>
    %41 = arith.mulf %36, %40 : vector<8x128xf32>
    %c0_23 = arith.constant 0 : index
    %c0_24 = arith.constant 0 : index
    %42 = vector.load %arg8[%c0_23, %c0_24] : memref<8x128xf32, #tpu.memory_space<vmem>>, vector<8x128xf32>
    tpu.vector_store %arg8[%c0_23, %c0_24], %41 {strides = array<i32>} : memref<8x128xf32, #tpu.memory_space<vmem>>, vector<8x128xf32>,
    return
  }
  func.func @transform_0(%arg0: i32) -> (i32, i32) {
    %c0_i32 = arith.constant 0 : i32
    %c0_i32_0 = arith.constant 0 : i32
    return %arg0, %c0_i32 : i32, i32
  }
  func.func @transform_1(%arg0: i32) -> (i32, i32) {
    %c0_i32 = arith.constant 0 : i32
    %c0_i32_0 = arith.constant 0 : i32
    %c0_i32_1 = arith.constant 0 : i32
    return %c0_i32, %c0_i32_0 : i32, i32
  }
  func.func @transform_2(%arg0: i32) -> (i32, i32) {
    %c0_i32 = arith.constant 0 : i32
    %c0_i32_0 = arith.constant 0 : i32
    %c0_i32_1 = arith.constant 0 : i32
    return %c0_i32, %c0_i32_0 : i32, i32
  }
  func.func @transform_3(%arg0: i32) -> (i32, i32) {
    %c0_i32 = arith.constant 0 : i32
    %c0_i32_0 = arith.constant 0 : i32
    %c0_i32_1 = arith.constant 0 : i32
    return %c0_i32, %c0_i32_0 : i32, i32
  }
  func.func @transform_4(%arg0: i32) -> (i32, i32) {
    %c0_i32 = arith.constant 0 : i32
    %c0_i32_0 = arith.constant 0 : i32
    %c0_i32_1 = arith.constant 0 : i32
    return %c0_i32, %c0_i32_0 : i32, i32
  }
  func.func @transform_5(%arg0: i32) -> (i32, i32) {
    %c0_i32 = arith.constant 0 : i32
    %c0_i32_0 = arith.constant 0 : i32
    %c0_i32_1 = arith.constant 0 : i32
    return %c0_i32, %c0_i32_0 : i32, i32
  }
  func.func @transform_6(%arg0: i32) -> (i32, i32) {
    %c0_i32 = arith.constant 0 : i32
    %c0_i32_0 = arith.constant 0 : i32
    %c0_i32_1 = arith.constant 0 : i32
    return %c0_i32, %c0_i32_0 : i32, i32
  }
  func.func @transform_7(%arg0: i32) -> (i32, i32) {
    %c0_i32 = arith.constant 0 : i32
    %c0_i32_0 = arith.constant 0 : i32
    return %arg0, %c0_i32 : i32, i32
  }
}

</mosaic_0001>

<bundles_post_ra>
// kernel: tpu_custom_call.1
= control target key start
LH: loop header
LB: loop body
LE: loop exit
PB: predicated region body
PF: predicated region fallthrough
CT: control target
= control target key end

     0   :  { %12 = vsyncpa [#allocation3], 0  ;;  %s1589_s0 = inlined_call_operand.hbm [shape: bf16[16,128], index: 0, kind: input, shape index: {}]   ;;  %s1590_s1 = inlined_call_operand.hbm [shape: bf16[128,128], index: 1, kind: input, shape index: {}]   ;;  %s1591_s2 = inlined_call_operand.vmem [shape: f32[1,128], index: 2, kind: input, shape index: {}]   ;;  %s1592_s3 = inlined_call_operand.hbm [shape: bf16[128,128], index: 3, kind: input, shape index: {}]   ;;  %s1593_s4 = inlined_call_operand.vmem [shape: f32[1,128], index: 4, kind: input, shape index: {}]   ;;  %s1594_s5 = inlined_call_operand.hbm [shape: bf16[128,128], index: 5, kind: input, shape index: {}]   ;;  %s1595_s6 = inlined_call_operand.vmem [shape: f32[1,128], index: 6, kind: input, shape index: {}]   ;;  %s1596_s7 = inlined_call_operand.hbm [shape: f32[16,128], index: 7, kind: output, shape index: {}]  }
   0x1   :  { %14 = vsyncpa [#allocation3 + $0x1], 0 }
   0x2   :  { %15 = vsyncpa [#allocation6], 0 }
   0x3   :  { %16 = vsyncpa [#allocation9], 0 }
   0x4   :  { %17 = vsyncpa [#allocation4], 0 }
   0x5   :  { %19 = vsyncpa [#allocation4 + $0x1], 0  ;;  %s1283_s24 = smov 0   ;;  %s1285_s25 = smov 0  }
   0x6   :  { %s1287_s26 = smov 0   ;;  %s1289_s27 = smov 0  }
   0x7 LB: > { %s1304_s28 = sadd.s32 4294967295, %s1232_s27   ;;  %s805_s29 = sadd.s32 4294967294, %s1232_s27   ;;  %s1232_s27 = sphi %s1289_s27, %s1622_s27   ;;  %s1228_s26 = sphi %s1287_s26, %s1621_s26   ;;  %s1224_s25 = sphi %s1285_s25, %s1620_s25   ;;  %s1220_s24 = sphi %s1283_s24, %s1619_s24  }
   0x8   : > { %p45_p0 = scmp.ne.s32.totalorder %s1224_s25, %s1220_s24  ;;  %p1597_p1 = scmp.eq.s32.totalorder %s1304_s28, 0 }
   0x9   : > { %p201_p3 = scmp.eq.s32.totalorder %s805_s29, 1  ;;  %p806_p5 = scmp.ge.s32.totalorder %s1232_s27, 1 }
   0xa   : > { %p1313_p4 = por %p1597_p1, %p45_p0  ;;  %p208_p7 = scmp.lt.s32.totalorder %s1232_s27, 3 }
   0xb   : > { %p1318_p6 = por %p201_p3, %p45_p0  ;;  %s1234_s10 = smov [#allocation5]  }
   0xc   : > { %s1601_s30 = scalar_select %p1313_p4, 1, 0 }
   0xd   : > { %s1602_s8 = scalar_select %p1318_p6, 1, 0 }
   0xe   : > { %p1323_p8 = pnand %p806_p5, %p208_p7  ;;  %s220_s11 = sshll.u32 %s1234_s10, 4  ;;  %s1327_s11 = int_to_ptr.vmem [resolvable:$true] %s220_s11 }
   0xf   : > { %1603 = sst [smem:[#allocation15_spill]] %s1602_s8  ;;  %s1235_s13 = smov [#allocation7]  }
  0x10   : > { %s1604_s9 = scalar_select %p1323_p8, 1, 0 }
  0x11   : > { %p953_p9 = pneg %p1323_p8  ;;  %s236_s14 = sshll.u32 %s1235_s13, 4  ;;  %s1338_s14 = int_to_ptr.vmem [resolvable:$true] %s236_s14 }
  0x12   : > { %s1236_s15 = smov [#allocation8]   ;;  %s1044_s19 = scalar_lea.hbm %s1590_s1, 1024 }
  0x13   : > { %p1334_p11 = pnand %p953_p9, %p1597_p1  ;;  %s1340_s16 = sshll.u32 %s1236_s15, 4  ;;  %s253_s16 = int_to_ptr.vmem [resolvable:$true] %s1340_s16 }
  0x14   : > { %p1045_p12 = scmp.ne.s32.totalorder %s1590_s1, %s1044_s19  ;;  %p1051_p5 = scmp.lt.u32.totalorder %s1044_s19, %s1590_s1 }
  0x15   : > { %p1350_p13 = pneg %p1334_p11 }
  0x17   : > { %p1047_p0 = pnand %p1350_p13, %p1045_p12 }
  0x19   : > { %p1048_p3 = pneg %p1047_p0 }
  0x1b   : > { %p1053_p7 = pnand %p1051_p5, %p1048_p3 }
  0x1d   : > { %1056 = shalt.err (!%p1053_p7)
}
  0x1e   : > { %s1057_s10 = scalar_lea.vmem %s1327_s11, 1024  ;;  %p1065_p2 = scmp.lt.s32.totalorder %s1327_s11, %s1327_s11 }
  0x1f   : > { %p1058_p9 = scmp.ne.s32.totalorder %s1327_s11, %s1057_s10  ;;  %p1066_p6 = scmp.lt.s32.totalorder %s1057_s10, %s1057_s10 }
  0x21   : > { %p1060_p10 = pnand %p1058_p9, %p1350_p13  ;;  %p1067_p12 = por %p1066_p6, %p1065_p2 }
  0x23   : > { %p1061_p1 = pneg %p1060_p10 }
  0x25   : > { %p1068_p0 = pnand %p1067_p12, %p1061_p1 }
  0x27   : > { %1071 = shalt.err (!%p1068_p0)
}
  0x28   : > { %s1237_s13 = smov 64   ;;  %s1238_s15 = smov 4  }
  0x29   : > { %956 = dma.hbm_to_vmem [thread:$0]  (!%p1334_p11), %s1590_s1, 1024, %s1327_s11, [#allocation6], %s1237_s13, %s1237_s13, %s1238_s15  }
  0x2a   : > { %s1072_s21 = scalar_lea.hbm %s1592_s3, 1024 }
  0x2b   : > { %p1073_p1 = scmp.ne.s32.totalorder %s1592_s3, %s1072_s21  ;;  %p1079_p10 = scmp.lt.u32.totalorder %s1072_s21, %s1592_s3 }
  0x2d   : > { %p1075_p2 = pnand %p1073_p1, %p1350_p13 }
  0x2f   : > { %p1076_p6 = pneg %p1075_p2 }
  0x31   : > { %p1081_p3 = pnand %p1079_p10, %p1076_p6 }
  0x33   : > { %1084 = shalt.err (!%p1081_p3)
}
  0x34   : > { %s1085_s11 = scalar_lea.vmem %s1338_s14, 1024  ;;  %p1093_p12 = scmp.lt.s32.totalorder %s1338_s14, %s1338_s14 }
  0x35   : > { %p1086_p5 = scmp.ne.s32.totalorder %s1338_s14, %s1085_s11  ;;  %p1094_p0 = scmp.lt.s32.totalorder %s1085_s11, %s1085_s11 }
  0x37   : > { %p1088_p7 = pnand %p1086_p5, %p1350_p13  ;;  %p1095_p1 = por %p1094_p0, %p1093_p12 }
  0x39   : > { %p1089_p9 = pneg %p1088_p7 }
  0x3b   : > { %p1096_p2 = pnand %p1095_p1, %p1089_p9 }
  0x3d   : > { %1099 = shalt.err (!%p1096_p2)
}
  0x3e   : > { %959 = dma.hbm_to_vmem [thread:$0]  (!%p1334_p11), %s1592_s3, 1024, %s1338_s14, [#allocation6], %s1237_s13, %s1237_s13, %s1238_s15  }
  0x3f   : > { %s1100_s20 = scalar_lea.hbm %s1594_s5, 1024 }
  0x40   : > { %p1101_p6 = scmp.ne.s32.totalorder %s1594_s5, %s1100_s20  ;;  %p1107_p5 = scmp.lt.u32.totalorder %s1100_s20, %s1594_s5 }
  0x42   : > { %p1103_p10 = pnand %p1101_p6, %p1350_p13 }
  0x44   : > { %p1104_p3 = pneg %p1103_p10 }
  0x46   : > { %p1109_p7 = pnand %p1107_p5, %p1104_p3 }
  0x48   : > { %1112 = shalt.err (!%p1109_p7)
}
  0x49   : > { %s1113_s11 = scalar_lea.vmem %s253_s16, 1024  ;;  %p1121_p1 = scmp.lt.s32.totalorder %s253_s16, %s253_s16 }
  0x4a   : > { %p1114_p9 = scmp.ne.s32.totalorder %s253_s16, %s1113_s11  ;;  %p1122_p2 = scmp.lt.s32.totalorder %s1113_s11, %s1113_s11 }
  0x4c   : > { %p1116_p12 = pnand %p1114_p9, %p1350_p13  ;;  %p1123_p4 = por %p1122_p2, %p1121_p1 }
  0x4e   : > { %p1117_p0 = pneg %p1116_p12 }
  0x50   : > { %p1124_p8 = pnand %p1123_p4, %p1117_p0 }
  0x52   : > { %1127 = shalt.err (!%p1124_p8)
}
  0x53   : > { %962 = dma.hbm_to_vmem [thread:$0]  (!%p1334_p11), %s1594_s5, 1024, %s253_s16, [#allocation9], %s1237_s13, %s1237_s13, %s1238_s15  }
  0x54   : > { %s1423_s22 = sadd.s32 1, %s1232_s27   ;;  %s32_s17 = sadd.s32 1, %s1228_s26 }
  0x55   : > { %s29_s12 = ssub.s32 %s1232_s27, %s1423_s22  ;;  %p39_p8 = scmp.ne.s32.totalorder %s1228_s26, %s1224_s25 }
  0x56   : > { %p30_p4 = scmp.eq.s32.totalorder %s29_s12, 0  ;;  %p40_p13 = scmp.eq.s32.totalorder %s1232_s27, 0 }
  0x57   : > { %p974_p6 = scmp.lt.s32.totalorder %s1232_s27, 2  ;;  %p1607_p3 = scmp.eq.s32.totalorder %s1304_s28, 1 }
  0x58   : > { %s1433_s18 = scalar_select %p30_p4, %s1228_s26, %s32_s17  }
  0x59   : > { %p41_p10 = por %p40_p13, %p39_p8  ;;  %p1437_p5 = por %p1607_p3, %p39_p8 }
  0x5a   : > { %s269_s20 = sand.u32 1, %s1228_s26   ;;  %s812_s21 = sshll.u32 %s1232_s27, 6 }
  0x5b   : > { %s811_s16 = sshll.u32 %s269_s20, 2  ;;  %s1446_s23 = scalar_lea.hbm %s1589_s0, %s812_s21 }
  0x5c   : > { %s273_s29 = scalar_lea.vmem [#allocation2], %s811_s16  ;;  %p1448_p11 = pnand %p974_p6, %p41_p10 }
  0x5d   : > { %s280_s10 = sshll.u32 %s273_s29, 4  ;;  %s270_s14 = scalar_lea.sflag [#allocation3], %s269_s20  ;;  %s1452_s10 = int_to_ptr.vmem [resolvable:$true] %s280_s10 }
  0x5e   : > { %s1128_s8 = scalar_lea.hbm %s1446_s23, 64  ;;  %p1130_p9 = pneg %p1448_p11 }
  0x5f   : > { %p1129_p7 = scmp.ne.s32.totalorder %s1446_s23, %s1128_s8  ;;  %s1133_s21 = scalar_lea.hbm %s1589_s0, 128 }
  0x60   : > { %p1134_p1 = scmp.lt.u32.totalorder %s1446_s23, %s1589_s0  ;;  %p1135_p2 = scmp.lt.u32.totalorder %s1133_s21, %s1128_s8 }
  0x61   : > { %p1131_p12 = pnand %p1130_p9, %p1129_p7  ;;  %p1137_p8 = scmp.lt.u32.totalorder %s1128_s8, %s1446_s23 }
  0x62   : > { %p1136_p4 = por %p1135_p2, %p1134_p1 }
  0x63   : > { %p1132_p0 = pneg %p1131_p12 }
  0x64   : > { %p1138_p13 = por %p1137_p8, %p1136_p4 }
  0x66   : > { %p1139_p6 = pnand %p1138_p13, %p1132_p0 }
  0x68   : > { %1142 = shalt.err (!%p1139_p6)
}
  0x69   : > { %s1143_s20 = scalar_lea.vmem %s1452_s10, 64  ;;  %s1239_s15 = smov [#allocation2]  }
  0x6a   : > { %p1144_p10 = scmp.ne.s32.totalorder %s1452_s10, %s1143_s20  ;;  %s1148_s29 = sshll.u32 %s1239_s15, 4  ;;  %s1149_s29 = int_to_ptr.vmem [resolvable:$false] %s1148_s29 }
  0x6b   : > { %s1150_s12 = scalar_lea.vmem %s1149_s29, 128  ;;  %p1151_p12 = scmp.lt.s32.totalorder %s1452_s10, %s1149_s29 }
  0x6c   : > { %p1146_p3 = pnand %p1144_p10, %p1130_p9  ;;  %p1152_p1 = scmp.lt.s32.totalorder %s1150_s12, %s1143_s20 }
  0x6e   : > { %p1147_p7 = pneg %p1146_p3  ;;  %p1153_p2 = por %p1152_p1, %p1151_p12 }
  0x70   : > { %p1154_p4 = pnand %p1153_p2, %p1147_p7 }
  0x72   : > { %1157 = shalt.err (!%p1154_p4)
}
  0x73   : > { %966 = dma.hbm_to_vmem [thread:$0]  (!%p1448_p11), %s1446_s23, 64, %s1452_s10, %s270_s14  }
  0x74   : > { %p1610_p0 = scmp.ne.s32.totalorder %s1604_s9, 0 }
  0x75   : > { %s1482_s8 = sand.u32 (!%p1610_p0), 1, %s1224_s25   ;;  %p1611_p9 = scmp.ne.s32.totalorder (!%p1610_p0), %s1601_s30, 0 }
  0x76   : > { %289 = sbr.rel (%p1610_p0) target bundleno = 998 (0x3e6), region = 48  ;;  %s814_s17 = sshll.u32 (!%p1610_p0), %s1482_s8, 2 }
  0x77   : > { %s292_s21 = scalar_lea.sflag (!%p1610_p0), [#allocation3], %s1482_s8  ;;  %s1486_s16 = scalar_lea.vmem (!%p1610_p0), [#allocation2], %s814_s17 }
  0x7d   : > { %1203 = dma.done.wait (%p1611_p9), %s292_s21, 64  }
  0x7e   : > { %1205 = vsyncadd (%p1611_p9), %s292_s21, 4294967232  ;;  %p1612_p11 = scmp.eq.s32.totalorder %s1304_s28, 0 }
  0x80   : > { %1207 = dma.done.wait (%p1612_p11), [#allocation6], 2048   ;;  %p1613_p8 = pmov %p1612_p11 }
  0x82   : > { %1209 = vsyncadd (%p1613_p8), [#allocation6], 4294965248  ;;  %p1614_p13 = pmov %p1613_p8 }
  0x83   : > { %p1615_p6 = pmov %p1613_p8 }
  0x84   : > { %1211 = dma.done.wait (%p1614_p13), [#allocation9], 1024  }
  0x85   : > { %1213 = vsyncadd (%p1615_p6), [#allocation9], 4294966272  ;;  %v1240_v0 = vmov 0.0   ;;  %vm1241_vm0 = vmmov 0   ;;  %v1018_v1 = vld [vmem:[#allocation5] sm:$0xff]   ;;  %v1019_v2 = vld [vmem:[#allocation5 + $0x8] sm:$0xff]  }
  0x86   : > { %877 = vmatprep.subr.bf16.mxu0 %v1240_v0  ;;  %893 = vmatprep.mubr.msk.bf16.mxu0 %vm1241_vm0, %v1240_v0  ;;  %v1020_v3 = vld [vmem:[#allocation5 + $0x10] sm:$0xff]   ;;  %v1026_v4 = vld [vmem:[#allocation7] sm:$0xff]   ;;  %v1021_v5 = vld [vmem:[#allocation5 + $0x18] sm:$0xff]   ;;  %s818_s13 = sshll.u32 %s1482_s8, 3  ;;  %s847_s20 = sshll.u32 %s1304_s28, 7 }
  0x87   : > { %897 = vmatprep.subr.bf16.mxu1 %v1240_v0  ;;  %913 = vmatprep.mubr.msk.bf16.mxu1 %vm1241_vm0, %v1240_v0  ;;  %v1027_v6 = vld [vmem:[#allocation7 + $0x8] sm:$0xff]   ;;  %v1022_v7 = vld [vmem:[#allocation5 + $0x20] sm:$0xff]   ;;  %v1028_v8 = vld [vmem:[#allocation7 + $0x10] sm:$0xff]   ;;  %s337_s15 = scalar_lea.vmem [#allocation10], %s818_s13  ;;  %s1545_s21 = scalar_lea.hbm %s1596_s7, %s847_s20 }
  0x88   : > { %878 = vmatpush3.bf16.msra.mxu0 %v1018_v1  ;;  %898 = vmatpush3.bf16.msra.mxu1 %v1026_v4  ;;  %v1023_v9 = vld [vmem:[#allocation5 + $0x28] sm:$0xff]   ;;  %v1029_v10 = vld [vmem:[#allocation7 + $0x18] sm:$0xff]   ;;  %v1024_v11 = vld [vmem:[#allocation5 + $0x30] sm:$0xff]   ;;  %s706_s29 = sshll.u32 %s337_s15, 4  ;;  %s1242_s28 = smov [#allocation10]   ;;  %s1547_s29 = int_to_ptr.vmem [resolvable:$true] %s706_s29 }
  0x89   : > { %879 = vmatprep.subr.bf16.mxu0 %v1240_v0  ;;  %899 = vmatprep.subr.bf16.mxu1 %v1240_v0  ;;  %v1030_v12 = vld [vmem:[#allocation7 + $0x20] sm:$0xff]   ;;  %v1025_v13 = vld [vmem:[#allocation5 + $0x38] sm:$0xff]   ;;  %v1031_v14 = vld [vmem:[#allocation7 + $0x28] sm:$0xff]   ;;  %s1158_s30 = scalar_lea.vmem %s1547_s29, 128  ;;  %s1162_s9 = sshll.u32 %s1242_s28, 4  ;;  %s1163_s9 = int_to_ptr.vmem [resolvable:$false] %s1162_s9 }
  0x8a   : > { %v339_v15 = vld [vmem:[%s1486_s16] sm:$0xf]  ;;  %v1032_v16 = vld [vmem:[#allocation7 + $0x30] sm:$0xff]   ;;  %v1034_v18 = vld [vmem:[#allocation8] sm:$0xff]   ;;  %s693_s16 = scalar_lea.sflag [#allocation4], %s1482_s8  ;;  %p1159_p10 = scmp.ne.s32.totalorder %s1547_s29, %s1158_s30 }
  0x8b   : > { %v1033_v17 = vld [vmem:[#allocation7 + $0x38] sm:$0xff]   ;;  %v1035_v19 = vld [vmem:[#allocation8 + $0x8] sm:$0xff]   ;;  %v1036_v20 = vld [vmem:[#allocation8 + $0x10] sm:$0xff]   ;;  %s1164_s23 = scalar_lea.vmem %s1163_s9, 256  ;;  %p1165_p12 = scmp.lt.s32.totalorder %s1547_s29, %s1163_s9 }
  0x8c   : > { %880 = vmatpush3.bf16.msra.mxu0 %v1019_v2  ;;  %900 = vmatpush3.bf16.msra.mxu1 %v1027_v6  ;;  %v1037_v21 = vld [vmem:[#allocation8 + $0x18] sm:$0xff]   ;;  %v1038_v22 = vld [vmem:[#allocation8 + $0x20] sm:$0xff]   ;;  %v1039_v23 = vld [vmem:[#allocation8 + $0x28] sm:$0xff]   ;;  %p1160_p3 = pnand %p1159_p10, %p1437_p5  ;;  %p1166_p1 = scmp.lt.s32.totalorder %s1164_s23, %s1158_s30 }
  0x8d   : > { %881 = vmatprep.subr.bf16.mxu0 %v1240_v0  ;;  %901 = vmatprep.subr.bf16.mxu1 %v1240_v0  ;;  %v819_v24 = vld [vmem:[%s1591_s2] ss:$0 sm:$0xff]  ;;  %v1040_v32 = vld [vmem:[#allocation8 + $0x30] sm:$0xff]  }
  0x8e   : > { %v1041_v33 = vld [vmem:[#allocation8 + $0x38] sm:$0xff]   ;;  %p1161_p7 = pneg %p1160_p3  ;;  %p1167_p2 = por %p1166_p1, %p1165_p12 }
  0x8f   : > { %v828_v34 = vld [vmem:[%s1593_s4] ss:$0 sm:$0xff] }
  0x90   : > { %882 = vmatpush3.bf16.msra.mxu0 %v1020_v3  ;;  %902 = vmatpush3.bf16.msra.mxu1 %v1028_v8  ;;  %v837_v42 = vld [vmem:[%s1595_s6] ss:$0 sm:$0xff]  ;;  %p1168_p4 = pnand %p1167_p2, %p1161_p7 }
  0x91   : > { %883 = vmatprep.subr.bf16.mxu0 %v1240_v0  ;;  %903 = vmatprep.subr.bf16.mxu1 %v1240_v0 }
  0x94   : > { %884 = vmatpush3.bf16.msra.mxu0 %v1021_v5  ;;  %904 = vmatpush3.bf16.msra.mxu1 %v1029_v10 }
  0x95   : > { %885 = vmatprep.subr.bf16.mxu0 %v1240_v0  ;;  %905 = vmatprep.subr.bf16.mxu1 %v1240_v0 }
  0x98   : > { %886 = vmatpush3.bf16.msra.mxu0 %v1022_v7  ;;  %906 = vmatpush3.bf16.msra.mxu1 %v1030_v12 }
  0x99   : > { %887 = vmatprep.subr.bf16.mxu0 %v1240_v0  ;;  %907 = vmatprep.subr.bf16.mxu1 %v1240_v0 }
  0x9c   : > { %888 = vmatpush3.bf16.msra.mxu0 %v1023_v9  ;;  %908 = vmatpush3.bf16.msra.mxu1 %v1031_v14 }
  0x9d   : > { %889 = vmatprep.subr.bf16.mxu0 %v1240_v0  ;;  %909 = vmatprep.subr.bf16.mxu1 %v1240_v0 }
  0xa0   : > { %890 = vmatpush3.bf16.msra.mxu0 %v1024_v11  ;;  %910 = vmatpush3.bf16.msra.mxu1 %v1032_v16 }
  0xa1   : > { %891 = vmatprep.subr.bf16.mxu0 %v1240_v0  ;;  %911 = vmatprep.subr.bf16.mxu1 %v1240_v0 }
  0xa4   : > { %892 = vmatpush3.bf16.msra.mxu0 %v1025_v13  ;;  %912 = vmatpush3.bf16.msra.mxu1 %v1033_v17 }
  0xa5   : > { %917 = vmatprep.subr.bf16.mxu0 %v1240_v0 }
  0xa7   : > { %894 = vmatmul.mubr.bf16.vlgmr.msra.gmra.mrb[0].mxu0 %v339_v15 }
  0xa8   : > { %933 = vmatprep.mubr.msk.bf16.mxu0 %vm1241_vm0, %v1240_v0  ;;  %918 = vmatpush3.bf16.msra.mxu0 %v1034_v18 }
  0xa9   : > { %919 = vmatprep.subr.bf16.mxu0 %v1240_v0 }
  0xac   : > { %920 = vmatpush3.bf16.msra.mxu0 %v1035_v19 }
  0xad   : > { %921 = vmatprep.subr.bf16.mxu0 %v1240_v0 }
  0xb0   : > { %922 = vmatpush3.bf16.msra.mxu0 %v1036_v20 }
  0xb1   : > { %923 = vmatprep.subr.bf16.mxu0 %v1240_v0 }
  0xb4   : > { %924 = vmatpush3.bf16.msra.mxu0 %v1037_v21 }
  0xb5   : > { %925 = vmatprep.subr.bf16.mxu0 %v1240_v0 }
  0xb8   : > { %926 = vmatpush3.bf16.msra.mxu0 %v1038_v22 }
  0xb9   : > { %927 = vmatprep.subr.bf16.mxu0 %v1240_v0 }
  0xbc   : > { %928 = vmatpush3.bf16.msra.mxu0 %v1039_v23 }
  0xbd   : > { %929 = vmatprep.subr.bf16.mxu0 %v1240_v0 }
  0xc0   : > { %930 = vmatpush3.bf16.msra.mxu0 %v1040_v32 }
  0xc1   : > { %931 = vmatprep.subr.bf16.mxu0 %v1240_v0 }
  0xc4   : > { %932 = vmatpush3.bf16.msra.mxu0 %v1041_v33 }
 0x17a   : > { %v445_v25 = vpop.f32.mrb[0].mxu0 }
 0x17b   : > { %v446_v26 = vadd.f32 %v819_v24, %v445_v25  ;;  %v895_v27 = vpop.f32.mrb[1].mxu0 }
 0x17c   : > { %v448_v28 = vpop.f32.mrb[2].mxu0 }
 0x17d   : > { %v451_v29 = vmax.f32 %v446_v26, 0.0  ;;  %v896_v30 = vpop.f32.mrb[3].mxu0 }
 0x17f   : > { %v469_v31 = vpack.c.bf16 %v451_v29, %v451_v29 }
 0x181   : > { %914 = vmatmul.mubr.bf16.vlgmr.msra.gmra.mrb[0].mxu1 %v469_v31 }
 0x254   : > { %v558_v35 = vpop.f32.mrb[0].mxu1 }
 0x255   : > { %v559_v36 = vadd.f32 %v828_v34, %v558_v35  ;;  %v915_v37 = vpop.f32.mrb[1].mxu1 }
 0x256   : > { %v561_v38 = vpop.f32.mrb[2].mxu1 }
 0x257   : > { %v564_v39 = vmax.f32 %v559_v36, 0.0  ;;  %v916_v40 = vpop.f32.mrb[3].mxu1 }
 0x259   : > { %v582_v41 = vpack.c.bf16 %v564_v39, %v564_v39 }
 0x25b   : > { %934 = vmatmul.mubr.bf16.vlgmr.msra.gmra.mrb[4].mxu0 %v582_v41 }
 0x32e   : > { %v671_v43 = vpop.f32.mrb[4].mxu0 }
 0x32f   : > { %v672_v44 = vadd.f32 %v837_v42, %v671_v43  ;;  %v935_v45 = vpop.f32.mrb[5].mxu0 }
 0x330   : > { %v674_v46 = vpop.f32.mrb[6].mxu0 }
 0x331   : > { %677 = vadd.xlane.f32.xlu0 %v672_v44  ;;  %v936_v47 = vpop.f32.mrb[7].mxu0  ;;  %v680_v48 = vmul.f32 %v672_v44, %v672_v44 }
 0x335   : > { %681 = vadd.xlane.f32.xlu0 %v680_v48 }
 0x3be   : > { %v678_v49 = vpop.xlane.xlu0 %677 }
 0x3bf   : > { %v679_v50 = vmul.f32 0.0625, %v678_v49 }
 0x3c1   : > { %v684_v52 = vmul.f32 %v679_v50, %v679_v50  ;;  %v687_v57 = vsub.f32 %v672_v44, %v679_v50 }
 0x3c2   : > { %v682_v51 = vpop.xlane.xlu0 %681 }
 0x3c3   : > { %v683_v53 = vmul.f32 0.0625, %v682_v51 }
 0x3c5   : > { %v685_v54 = vsub.f32 %v683_v53, %v684_v52 }
 0x3c7   : > { %v686_v55 = vmax.f32 %v685_v54, 0.0 }
 0x3c9   : > { %v688_v56 = vadd.f32 1e-05, %v686_v55 }
 0x3cb   : > { %1042 = vrsqrt.f32 %v688_v56 }
 0x3d5   : > { %v1043_v58 = vpop.eup %1042 }
 0x3d6   : > { %v690_v59 = vmul.f32 %v1043_v58, %v687_v57 }
 0x3d8   : > { %691 = vst [vmem:[%s337_s15] sm:$0xff] %v690_v59 }
 0x3d9   : > { %1171 = shalt.err (!%p1168_p4)
}
 0x3da   : > { %s1172_s8 = scalar_lea.hbm %s1545_s21, 128  ;;  %s1176_s14 = scalar_lea.hbm %s1596_s7, 256 }
 0x3db   : > { %p1173_p0 = scmp.ne.s32.totalorder %s1545_s21, %s1172_s8  ;;  %p1177_p8 = scmp.lt.u32.totalorder %s1545_s21, %s1596_s7 }
 0x3dc   : > { %p1178_p13 = scmp.lt.u32.totalorder %s1176_s14, %s1172_s8  ;;  %p1180_p10 = scmp.lt.u32.totalorder %s1172_s8, %s1545_s21 }
 0x3dd   : > { %p1174_p9 = pnand %p1173_p0, %p1437_p5 }
 0x3de   : > { %p1179_p6 = por %p1178_p13, %p1177_p8 }
 0x3df   : > { %p1175_p11 = pneg %p1174_p9 }
 0x3e0   : > { %p1181_p3 = por %p1180_p10, %p1179_p6 }
 0x3e2   : > { %p1182_p7 = pnand %p1181_p3, %p1175_p11 }
 0x3e4   : > { %1185 = shalt.err (!%p1182_p7)
}
 0x3e5   : > { %951 = dma.vmem_to_hbm [thread:$0]  (%p1437_p5), %s1547_s29, 128, %s1545_s21, %s693_s16  }
 0x3e6 PF: > { %s1616_s15 = sld [smem:[#allocation15_spill]]  ;;  %s718_s12 = sand.u32 1, %s1220_s24  }
 0x3e7   : > { %p1618_p1 = scmp.ge.s32.totalorder %s1232_s27, 2  ;;  %s719_s17 = scalar_lea.sflag [#allocation4], %s718_s12 }
 0x3ec   : > { %p1617_p12 = scmp.ne.s32.totalorder %s1616_s15, 0 }
 0x3ee   : > { %p968_p2 = pnand %p1618_p1, %p1617_p12 }
 0x3f0   : > { %1215 = dma.done.wait (!%p968_p2), %s719_s17, 128  }
 0x3f1   : > { %1217 = vsyncadd (!%p968_p2), %s719_s17, 4294967168  ;;  %p22_p4 = scmp.ge.s32.totalorder %s1423_s22, 4   ;;  %s1619_s24 = smov %s1224_s25 }
 0x3f2   : > { %s1620_s25 = smov %s1228_s26  ;;  %s1621_s26 = smov %s1433_s18 }
 0x3f3   : > { %s1622_s27 = smov %s1423_s22  ;;  %24 = sbr.rel (!%p22_p4) target bundleno = 7 (0x7), region = 105 }
 0x3fa   :  { %724 = vsyncpa [#allocation3], 1 }
 0x3fb   :  { %726 = vsyncpa [#allocation3 + $0x1], 1 }
 0x3fc   :  { %727 = vsyncpa [#allocation6], 1 }
 0x3fd   :  { %728 = vsyncpa [#allocation9], 1 }
 0x3fe   :  { %729 = vsyncpa [#allocation4], 1 }
 0x3ff   :  { %731 = vsyncpa [#allocation4 + $0x1], 1 }

// kernel: tpu_custom_call.1
= control target key start
LH: loop header
LB: loop body
LE: loop exit
PB: predicated region body
PF: predicated region fallthrough
CT: control target
= control target key end

     0   :  { %12 = vsyncpa [#allocation3], 0  ;;  %s1589_s0 = inlined_call_operand.hbm [shape: bf16[16,128], index: 0, kind: input, shape index: {}]   ;;  %s1590_s1 = inlined_call_operand.hbm [shape: bf16[128,128], index: 1, kind: input, shape index: {}]   ;;  %s1591_s2 = inlined_call_operand.vmem [shape: f32[1,128], index: 2, kind: input, shape index: {}]   ;;  %s1592_s3 = inlined_call_operand.hbm [shape: bf16[128,128], index: 3, kind: input, shape index: {}]   ;;  %s1593_s4 = inlined_call_operand.vmem [shape: f32[1,128], index: 4, kind: input, shape index: {}]   ;;  %s1594_s5 = inlined_call_operand.hbm [shape: bf16[128,128], index: 5, kind: input, shape index: {}]   ;;  %s1595_s6 = inlined_call_operand.vmem [shape: f32[1,128], index: 6, kind: input, shape index: {}]   ;;  %s1596_s7 = inlined_call_operand.hbm [shape: f32[16,128], index: 7, kind: output, shape index: {}]  }
   0x1   :  { %14 = vsyncpa [#allocation3 + $0x1], 0 }
   0x2   :  { %15 = vsyncpa [#allocation6], 0 }
   0x3   :  { %16 = vsyncpa [#allocation9], 0 }
   0x4   :  { %17 = vsyncpa [#allocation4], 0 }
   0x5   :  { %19 = vsyncpa [#allocation4 + $0x1], 0  ;;  %s1283_s24 = smov 0   ;;  %s1285_s25 = smov 0  }
   0x6   :  { %s1287_s26 = smov 0   ;;  %s1289_s27 = smov 0  }
   0x7 LB: > { %s1304_s28 = sadd.s32 4294967295, %s1232_s27   ;;  %s805_s29 = sadd.s32 4294967294, %s1232_s27   ;;  %s1232_s27 = sphi %s1289_s27, %s1622_s27   ;;  %s1228_s26 = sphi %s1287_s26, %s1621_s26   ;;  %s1224_s25 = sphi %s1285_s25, %s1620_s25   ;;  %s1220_s24 = sphi %s1283_s24, %s1619_s24  }
   0x8   : > { %p45_p0 = scmp.ne.s32.totalorder %s1224_s25, %s1220_s24  ;;  %p1597_p1 = scmp.eq.s32.totalorder %s1304_s28, 0 }
   0x9   : > { %p201_p3 = scmp.eq.s32.totalorder %s805_s29, 1  ;;  %p806_p5 = scmp.ge.s32.totalorder %s1232_s27, 1 }
   0xa   : > { %p1313_p4 = por %p1597_p1, %p45_p0  ;;  %p208_p7 = scmp.lt.s32.totalorder %s1232_s27, 3 }
   0xb   : > { %p1318_p6 = por %p201_p3, %p45_p0  ;;  %s1234_s10 = smov [#allocation5]  }
   0xc   : > { %s1601_s30 = scalar_select %p1313_p4, 1, 0 }
   0xd   : > { %s1602_s8 = scalar_select %p1318_p6, 1, 0 }
   0xe   : > { %p1323_p8 = pnand %p806_p5, %p208_p7  ;;  %s220_s11 = sshll.u32 %s1234_s10, 4  ;;  %s1327_s11 = int_to_ptr.vmem [resolvable:$true] %s220_s11 }
   0xf   : > { %1603 = sst [smem:[#allocation15_spill]] %s1602_s8  ;;  %s1235_s13 = smov [#allocation7]  }
  0x10   : > { %s1604_s9 = scalar_select %p1323_p8, 1, 0 }
  0x11   : > { %p953_p9 = pneg %p1323_p8  ;;  %s236_s14 = sshll.u32 %s1235_s13, 4  ;;  %s1338_s14 = int_to_ptr.vmem [resolvable:$true] %s236_s14 }
  0x12   : > { %s1236_s15 = smov [#allocation8]   ;;  %s1044_s19 = scalar_lea.hbm %s1590_s1, 1024 }
  0x13   : > { %p1334_p11 = pnand %p953_p9, %p1597_p1  ;;  %s1340_s16 = sshll.u32 %s1236_s15, 4  ;;  %s253_s16 = int_to_ptr.vmem [resolvable:$true] %s1340_s16 }
  0x14   : > { %p1045_p12 = scmp.ne.s32.totalorder %s1590_s1, %s1044_s19  ;;  %p1051_p5 = scmp.lt.u32.totalorder %s1044_s19, %s1590_s1 }
  0x15   : > { %p1350_p13 = pneg %p1334_p11 }
  0x17   : > { %p1047_p0 = pnand %p1350_p13, %p1045_p12 }
  0x19   : > { %p1048_p3 = pneg %p1047_p0 }
  0x1b   : > { %p1053_p7 = pnand %p1051_p5, %p1048_p3 }
  0x1d   : > { %1056 = shalt.err (!%p1053_p7)
}
  0x1e   : > { %s1057_s10 = scalar_lea.vmem %s1327_s11, 1024  ;;  %p1065_p2 = scmp.lt.s32.totalorder %s1327_s11, %s1327_s11 }
  0x1f   : > { %p1058_p9 = scmp.ne.s32.totalorder %s1327_s11, %s1057_s10  ;;  %p1066_p6 = scmp.lt.s32.totalorder %s1057_s10, %s1057_s10 }
  0x21   : > { %p1060_p10 = pnand %p1058_p9, %p1350_p13  ;;  %p1067_p12 = por %p1066_p6, %p1065_p2 }
  0x23   : > { %p1061_p1 = pneg %p1060_p10 }
  0x25   : > { %p1068_p0 = pnand %p1067_p12, %p1061_p1 }
  0x27   : > { %1071 = shalt.err (!%p1068_p0)
}
  0x28   : > { %s1237_s13 = smov 64   ;;  %s1238_s15 = smov 4  }
  0x29   : > { %956 = dma.hbm_to_vmem [thread:$0]  (!%p1334_p11), %s1590_s1, 1024, %s1327_s11, [#allocation6], %s1237_s13, %s1237_s13, %s1238_s15  }
  0x2a   : > { %s1072_s21 = scalar_lea.hbm %s1592_s3, 1024 }
  0x2b   : > { %p1073_p1 = scmp.ne.s32.totalorder %s1592_s3, %s1072_s21  ;;  %p1079_p10 = scmp.lt.u32.totalorder %s1072_s21, %s1592_s3 }
  0x2d   : > { %p1075_p2 = pnand %p1073_p1, %p1350_p13 }
  0x2f   : > { %p1076_p6 = pneg %p1075_p2 }
  0x31   : > { %p1081_p3 = pnand %p1079_p10, %p1076_p6 }
  0x33   : > { %1084 = shalt.err (!%p1081_p3)
}
  0x34   : > { %s1085_s11 = scalar_lea.vmem %s1338_s14, 1024  ;;  %p1093_p12 = scmp.lt.s32.totalorder %s1338_s14, %s1338_s14 }
  0x35   : > { %p1086_p5 = scmp.ne.s32.totalorder %s1338_s14, %s1085_s11  ;;  %p1094_p0 = scmp.lt.s32.totalorder %s1085_s11, %s1085_s11 }
  0x37   : > { %p1088_p7 = pnand %p1086_p5, %p1350_p13  ;;  %p1095_p1 = por %p1094_p0, %p1093_p12 }
  0x39   : > { %p1089_p9 = pneg %p1088_p7 }
  0x3b   : > { %p1096_p2 = pnand %p1095_p1, %p1089_p9 }
  0x3d   : > { %1099 = shalt.err (!%p1096_p2)
}
  0x3e   : > { %959 = dma.hbm_to_vmem [thread:$0]  (!%p1334_p11), %s1592_s3, 1024, %s1338_s14, [#allocation6], %s1237_s13, %s1237_s13, %s1238_s15  }
  0x3f   : > { %s1100_s20 = scalar_lea.hbm %s1594_s5, 1024 }
  0x40   : > { %p1101_p6 = scmp.ne.s32.totalorder %s1594_s5, %s1100_s20  ;;  %p1107_p5 = scmp.lt.u32.totalorder %s1100_s20, %s1594_s5 }
  0x42   : > { %p1103_p10 = pnand %p1101_p6, %p1350_p13 }
  0x44   : > { %p1104_p3 = pneg %p1103_p10 }
  0x46   : > { %p1109_p7 = pnand %p1107_p5, %p1104_p3 }
  0x48   : > { %1112 = shalt.err (!%p1109_p7)
}
  0x49   : > { %s1113_s11 = scalar_lea.vmem %s253_s16, 1024  ;;  %p1121_p1 = scmp.lt.s32.totalorder %s253_s16, %s253_s16 }
  0x4a   : > { %p1114_p9 = scmp.ne.s32.totalorder %s253_s16, %s1113_s11  ;;  %p1122_p2 = scmp.lt.s32.totalorder %s1113_s11, %s1113_s11 }
  0x4c   : > { %p1116_p12 = pnand %p1114_p9, %p1350_p13  ;;  %p1123_p4 = por %p1122_p2, %p1121_p1 }
  0x4e   : > { %p1117_p0 = pneg %p1116_p12 }
  0x50   : > { %p1124_p8 = pnand %p1123_p4, %p1117_p0 }
  0x52   : > { %1127 = shalt.err (!%p1124_p8)
}
  0x53   : > { %962 = dma.hbm_to_vmem [thread:$0]  (!%p1334_p11), %s1594_s5, 1024, %s253_s16, [#allocation9], %s1237_s13, %s1237_s13, %s1238_s15  }
  0x54   : > { %s1423_s22 = sadd.s32 1, %s1232_s27   ;;  %s32_s17 = sadd.s32 1, %s1228_s26 }
  0x55   : > { %s29_s12 = ssub.s32 %s1232_s27, %s1423_s22  ;;  %p39_p8 = scmp.ne.s32.totalorder %s1228_s26, %s1224_s25 }
  0x56   : > { %p30_p4 = scmp.eq.s32.totalorder %s29_s12, 0  ;;  %p40_p13 = scmp.eq.s32.totalorder %s1232_s27, 0 }
  0x57   : > { %p974_p6 = scmp.lt.s32.totalorder %s1232_s27, 2  ;;  %p1607_p3 = scmp.eq.s32.totalorder %s1304_s28, 1 }
  0x58   : > { %s1433_s18 = scalar_select %p30_p4, %s1228_s26, %s32_s17  }
  0x59   : > { %p41_p10 = por %p40_p13, %p39_p8  ;;  %p1437_p5 = por %p1607_p3, %p39_p8 }
  0x5a   : > { %s269_s20 = sand.u32 1, %s1228_s26   ;;  %s812_s21 = sshll.u32 %s1232_s27, 6 }
  0x5b   : > { %s811_s16 = sshll.u32 %s269_s20, 2  ;;  %s1446_s23 = scalar_lea.hbm %s1589_s0, %s812_s21 }
  0x5c   : > { %s273_s29 = scalar_lea.vmem [#allocation2], %s811_s16  ;;  %p1448_p11 = pnand %p974_p6, %p41_p10 }
  0x5d   : > { %s280_s10 = sshll.u32 %s273_s29, 4  ;;  %s270_s14 = scalar_lea.sflag [#allocation3], %s269_s20  ;;  %s1452_s10 = int_to_ptr.vmem [resolvable:$true] %s280_s10 }
  0x5e   : > { %s1128_s8 = scalar_lea.hbm %s1446_s23, 64  ;;  %p1130_p9 = pneg %p1448_p11 }
  0x5f   : > { %p1129_p7 = scmp.ne.s32.totalorder %s1446_s23, %s1128_s8  ;;  %s1133_s21 = scalar_lea.hbm %s1589_s0, 128 }
  0x60   : > { %p1134_p1 = scmp.lt.u32.totalorder %s1446_s23, %s1589_s0  ;;  %p1135_p2 = scmp.lt.u32.totalorder %s1133_s21, %s1128_s8 }
  0x61   : > { %p1131_p12 = pnand %p1130_p9, %p1129_p7  ;;  %p1137_p8 = scmp.lt.u32.totalorder %s1128_s8, %s1446_s23 }
  0x62   : > { %p1136_p4 = por %p1135_p2, %p1134_p1 }
  0x63   : > { %p1132_p0 = pneg %p1131_p12 }
  0x64   : > { %p1138_p13 = por %p1137_p8, %p1136_p4 }
  0x66   : > { %p1139_p6 = pnand %p1138_p13, %p1132_p0 }
  0x68   : > { %1142 = shalt.err (!%p1139_p6)
}
  0x69   : > { %s1143_s20 = scalar_lea.vmem %s1452_s10, 64  ;;  %s1239_s15 = smov [#allocation2]  }
  0x6a   : > { %p1144_p10 = scmp.ne.s32.totalorder %s1452_s10, %s1143_s20  ;;  %s1148_s29 = sshll.u32 %s1239_s15, 4  ;;  %s1149_s29 = int_to_ptr.vmem [resolvable:$false] %s1148_s29 }
  0x6b   : > { %s1150_s12 = scalar_lea.vmem %s1149_s29, 128  ;;  %p1151_p12 = scmp.lt.s32.totalorder %s1452_s10, %s1149_s29 }
  0x6c   : > { %p1146_p3 = pnand %p1144_p10, %p1130_p9  ;;  %p1152_p1 = scmp.lt.s32.totalorder %s1150_s12, %s1143_s20 }
  0x6e   : > { %p1147_p7 = pneg %p1146_p3  ;;  %p1153_p2 = por %p1152_p1, %p1151_p12 }
  0x70   : > { %p1154_p4 = pnand %p1153_p2, %p1147_p7 }
  0x72   : > { %1157 = shalt.err (!%p1154_p4)
}
  0x73   : > { %966 = dma.hbm_to_vmem [thread:$0]  (!%p1448_p11), %s1446_s23, 64, %s1452_s10, %s270_s14  }
  0x74   : > { %p1610_p0 = scmp.ne.s32.totalorder %s1604_s9, 0 }
  0x75   : > { %s1482_s8 = sand.u32 (!%p1610_p0), 1, %s1224_s25   ;;  %p1611_p9 = scmp.ne.s32.totalorder (!%p1610_p0), %s1601_s30, 0 }
  0x76   : > { %289 = sbr.rel (%p1610_p0) target bundleno = 998 (0x3e6), region = 48  ;;  %s814_s17 = sshll.u32 (!%p1610_p0), %s1482_s8, 2 }
  0x77   : > { %s292_s21 = scalar_lea.sflag (!%p1610_p0), [#allocation3], %s1482_s8  ;;  %s1486_s16 = scalar_lea.vmem (!%p1610_p0), [#allocation2], %s814_s17 }
  0x7d   : > { %1203 = dma.done.wait (%p1611_p9), %s292_s21, 64  }
  0x7e   : > { %1205 = vsyncadd (%p1611_p9), %s292_s21, 4294967232  ;;  %p1612_p11 = scmp.eq.s32.totalorder %s1304_s28, 0 }
  0x80   : > { %1207 = dma.done.wait (%p1612_p11), [#allocation6], 2048   ;;  %p1613_p8 = pmov %p1612_p11 }
  0x82   : > { %1209 = vsyncadd (%p1613_p8), [#allocation6], 4294965248  ;;  %p1614_p13 = pmov %p1613_p8 }
  0x83   : > { %p1615_p6 = pmov %p1613_p8 }
  0x84   : > { %1211 = dma.done.wait (%p1614_p13), [#allocation9], 1024  }
  0x85   : > { %1213 = vsyncadd (%p1615_p6), [#allocation9], 4294966272  ;;  %v1240_v0 = vmov 0.0   ;;  %vm1241_vm0 = vmmov 0   ;;  %v1018_v1 = vld [vmem:[#allocation5] sm:$0xff]   ;;  %v1019_v2 = vld [vmem:[#allocation5 + $0x8] sm:$0xff]  }
  0x86   : > { %877 = vmatprep.subr.bf16.mxu0 %v1240_v0  ;;  %893 = vmatprep.mubr.msk.bf16.mxu0 %vm1241_vm0, %v1240_v0  ;;  %v1020_v3 = vld [vmem:[#allocation5 + $0x10] sm:$0xff]   ;;  %v1026_v4 = vld [vmem:[#allocation7] sm:$0xff]   ;;  %v1021_v5 = vld [vmem:[#allocation5 + $0x18] sm:$0xff]   ;;  %s818_s13 = sshll.u32 %s1482_s8, 3  ;;  %s847_s20 = sshll.u32 %s1304_s28, 7 }
  0x87   : > { %897 = vmatprep.subr.bf16.mxu1 %v1240_v0  ;;  %913 = vmatprep.mubr.msk.bf16.mxu1 %vm1241_vm0, %v1240_v0  ;;  %v1027_v6 = vld [vmem:[#allocation7 + $0x8] sm:$0xff]   ;;  %v1022_v7 = vld [vmem:[#allocation5 + $0x20] sm:$0xff]   ;;  %v1028_v8 = vld [vmem:[#allocation7 + $0x10] sm:$0xff]   ;;  %s337_s15 = scalar_lea.vmem [#allocation10], %s818_s13  ;;  %s1545_s21 = scalar_lea.hbm %s1596_s7, %s847_s20 }
  0x88   : > { %878 = vmatpush3.bf16.msra.mxu0 %v1018_v1  ;;  %898 = vmatpush3.bf16.msra.mxu1 %v1026_v4  ;;  %v1023_v9 = vld [vmem:[#allocation5 + $0x28] sm:$0xff]   ;;  %v1029_v10 = vld [vmem:[#allocation7 + $0x18] sm:$0xff]   ;;  %v1024_v11 = vld [vmem:[#allocation5 + $0x30] sm:$0xff]   ;;  %s706_s29 = sshll.u32 %s337_s15, 4  ;;  %s1242_s28 = smov [#allocation10]   ;;  %s1547_s29 = int_to_ptr.vmem [resolvable:$true] %s706_s29 }
  0x89   : > { %879 = vmatprep.subr.bf16.mxu0 %v1240_v0  ;;  %899 = vmatprep.subr.bf16.mxu1 %v1240_v0  ;;  %v1030_v12 = vld [vmem:[#allocation7 + $0x20] sm:$0xff]   ;;  %v1025_v13 = vld [vmem:[#allocation5 + $0x38] sm:$0xff]   ;;  %v1031_v14 = vld [vmem:[#allocation7 + $0x28] sm:$0xff]   ;;  %s1158_s30 = scalar_lea.vmem %s1547_s29, 128  ;;  %s1162_s9 = sshll.u32 %s1242_s28, 4  ;;  %s1163_s9 = int_to_ptr.vmem [resolvable:$false] %s1162_s9 }
  0x8a   : > { %v339_v15 = vld [vmem:[%s1486_s16] sm:$0xf]  ;;  %v1032_v16 = vld [vmem:[#allocation7 + $0x30] sm:$0xff]   ;;  %v1034_v18 = vld [vmem:[#allocation8] sm:$0xff]   ;;  %s693_s16 = scalar_lea.sflag [#allocation4], %s1482_s8  ;;  %p1159_p10 = scmp.ne.s32.totalorder %s1547_s29, %s1158_s30 }
  0x8b   : > { %v1033_v17 = vld [vmem:[#allocation7 + $0x38] sm:$0xff]   ;;  %v1035_v19 = vld [vmem:[#allocation8 + $0x8] sm:$0xff]   ;;  %v1036_v20 = vld [vmem:[#allocation8 + $0x10] sm:$0xff]   ;;  %s1164_s23 = scalar_lea.vmem %s1163_s9, 256  ;;  %p1165_p12 = scmp.lt.s32.totalorder %s1547_s29, %s1163_s9 }
  0x8c   : > { %880 = vmatpush3.bf16.msra.mxu0 %v1019_v2  ;;  %900 = vmatpush3.bf16.msra.mxu1 %v1027_v6  ;;  %v1037_v21 = vld [vmem:[#allocation8 + $0x18] sm:$0xff]   ;;  %v1038_v22 = vld [vmem:[#allocation8 + $0x20] sm:$0xff]   ;;  %v1039_v23 = vld [vmem:[#allocation8 + $0x28] sm:$0xff]   ;;  %p1160_p3 = pnand %p1159_p10, %p1437_p5  ;;  %p1166_p1 = scmp.lt.s32.totalorder %s1164_s23, %s1158_s30 }
  0x8d   : > { %881 = vmatprep.subr.bf16.mxu0 %v1240_v0  ;;  %901 = vmatprep.subr.bf16.mxu1 %v1240_v0  ;;  %v819_v24 = vld [vmem:[%s1591_s2] ss:$0 sm:$0xff]  ;;  %v1040_v32 = vld [vmem:[#allocation8 + $0x30] sm:$0xff]  }
  0x8e   : > { %v1041_v33 = vld [vmem:[#allocation8 + $0x38] sm:$0xff]   ;;  %p1161_p7 = pneg %p1160_p3  ;;  %p1167_p2 = por %p1166_p1, %p1165_p12 }
  0x8f   : > { %v828_v34 = vld [vmem:[%s1593_s4] ss:$0 sm:$0xff] }
  0x90   : > { %882 = vmatpush3.bf16.msra.mxu0 %v1020_v3  ;;  %902 = vmatpush3.bf16.msra.mxu1 %v1028_v8  ;;  %v837_v42 = vld [vmem:[%s1595_s6] ss:$0 sm:$0xff]  ;;  %p1168_p4 = pnand %p1167_p2, %p1161_p7 }
  0x91   : > { %883 = vmatprep.subr.bf16.mxu0 %v1240_v0  ;;  %903 = vmatprep.subr.bf16.mxu1 %v1240_v0 }
  0x94   : > { %884 = vmatpush3.bf16.msra.mxu0 %v1021_v5  ;;  %904 = vmatpush3.bf16.msra.mxu1 %v1029_v10 }
  0x95   : > { %885 = vmatprep.subr.bf16.mxu0 %v1240_v0  ;;  %905 = vmatprep.subr.bf16.mxu1 %v1240_v0 }
  0x98   : > { %886 = vmatpush3.bf16.msra.mxu0 %v1022_v7  ;;  %906 = vmatpush3.bf16.msra.mxu1 %v1030_v12 }
  0x99   : > { %887 = vmatprep.subr.bf16.mxu0 %v1240_v0  ;;  %907 = vmatprep.subr.bf16.mxu1 %v1240_v0 }
  0x9c   : > { %888 = vmatpush3.bf16.msra.mxu0 %v1023_v9  ;;  %908 = vmatpush3.bf16.msra.mxu1 %v1031_v14 }
  0x9d   : > { %889 = vmatprep.subr.bf16.mxu0 %v1240_v0  ;;  %909 = vmatprep.subr.bf16.mxu1 %v1240_v0 }
  0xa0   : > { %890 = vmatpush3.bf16.msra.mxu0 %v1024_v11  ;;  %910 = vmatpush3.bf16.msra.mxu1 %v1032_v16 }
  0xa1   : > { %891 = vmatprep.subr.bf16.mxu0 %v1240_v0  ;;  %911 = vmatprep.subr.bf16.mxu1 %v1240_v0 }
  0xa4   : > { %892 = vmatpush3.bf16.msra.mxu0 %v1025_v13  ;;  %912 = vmatpush3.bf16.msra.mxu1 %v1033_v17 }
  0xa5   : > { %917 = vmatprep.subr.bf16.mxu0 %v1240_v0 }
  0xa7   : > { %894 = vmatmul.mubr.bf16.vlgmr.msra.gmra.mrb[0].mxu0 %v339_v15 }
  0xa8   : > { %933 = vmatprep.mubr.msk.bf16.mxu0 %vm1241_vm0, %v1240_v0  ;;  %918 = vmatpush3.bf16.msra.mxu0 %v1034_v18 }
  0xa9   : > { %919 = vmatprep.subr.bf16.mxu0 %v1240_v0 }
  0xac   : > { %920 = vmatpush3.bf16.msra.mxu0 %v1035_v19 }
  0xad   : > { %921 = vmatprep.subr.bf16.mxu0 %v1240_v0 }
  0xb0   : > { %922 = vmatpush3.bf16.msra.mxu0 %v1036_v20 }
  0xb1   : > { %923 = vmatprep.subr.bf16.mxu0 %v1240_v0 }
  0xb4   : > { %924 = vmatpush3.bf16.msra.mxu0 %v1037_v21 }
  0xb5   : > { %925 = vmatprep.subr.bf16.mxu0 %v1240_v0 }
  0xb8   : > { %926 = vmatpush3.bf16.msra.mxu0 %v1038_v22 }
  0xb9   : > { %927 = vmatprep.subr.bf16.mxu0 %v1240_v0 }
  0xbc   : > { %928 = vmatpush3.bf16.msra.mxu0 %v1039_v23 }
  0xbd   : > { %929 = vmatprep.subr.bf16.mxu0 %v1240_v0 }
  0xc0   : > { %930 = vmatpush3.bf16.msra.mxu0 %v1040_v32 }
  0xc1   : > { %931 = vmatprep.subr.bf16.mxu0 %v1240_v0 }
  0xc4   : > { %932 = vmatpush3.bf16.msra.mxu0 %v1041_v33 }
 0x17a   : > { %v445_v25 = vpop.f32.mrb[0].mxu0 }
 0x17b   : > { %v446_v26 = vadd.f32 %v819_v24, %v445_v25  ;;  %v895_v27 = vpop.f32.mrb[1].mxu0 }
 0x17c   : > { %v448_v28 = vpop.f32.mrb[2].mxu0 }
 0x17d   : > { %v451_v29 = vmax.f32 %v446_v26, 0.0  ;;  %v896_v30 = vpop.f32.mrb[3].mxu0 }
 0x17f   : > { %v469_v31 = vpack.c.bf16 %v451_v29, %v451_v29 }
 0x181   : > { %914 = vmatmul.mubr.bf16.vlgmr.msra.gmra.mrb[0].mxu1 %v469_v31 }
 0x254   : > { %v558_v35 = vpop.f32.mrb[0].mxu1 }
 0x255   : > { %v559_v36 = vadd.f32 %v828_v34, %v558_v35  ;;  %v915_v37 = vpop.f32.mrb[1].mxu1 }
 0x256   : > { %v561_v38 = vpop.f32.mrb[2].mxu1 }
 0x257   : > { %v564_v39 = vmax.f32 %v559_v36, 0.0  ;;  %v916_v40 = vpop.f32.mrb[3].mxu1 }
 0x259   : > { %v582_v41 = vpack.c.bf16 %v564_v39, %v564_v39 }
 0x25b   : > { %934 = vmatmul.mubr.bf16.vlgmr.msra.gmra.mrb[4].mxu0 %v582_v41 }
 0x32e   : > { %v671_v43 = vpop.f32.mrb[4].mxu0 }
 0x32f   : > { %v672_v44 = vadd.f32 %v837_v42, %v671_v43  ;;  %v935_v45 = vpop.f32.mrb[5].mxu0 }
 0x330   : > { %v674_v46 = vpop.f32.mrb[6].mxu0 }
 0x331   : > { %677 = vadd.xlane.f32.xlu0 %v672_v44  ;;  %v936_v47 = vpop.f32.mrb[7].mxu0  ;;  %v680_v48 = vmul.f32 %v672_v44, %v672_v44 }
 0x335   : > { %681 = vadd.xlane.f32.xlu0 %v680_v48 }
 0x3be   : > { %v678_v49 = vpop.xlane.xlu0 %677 }
 0x3bf   : > { %v679_v50 = vmul.f32 0.0625, %v678_v49 }
 0x3c1   : > { %v684_v52 = vmul.f32 %v679_v50, %v679_v50  ;;  %v687_v57 = vsub.f32 %v672_v44, %v679_v50 }
 0x3c2   : > { %v682_v51 = vpop.xlane.xlu0 %681 }
 0x3c3   : > { %v683_v53 = vmul.f32 0.0625, %v682_v51 }
 0x3c5   : > { %v685_v54 = vsub.f32 %v683_v53, %v684_v52 }
 0x3c7   : > { %v686_v55 = vmax.f32 %v685_v54, 0.0 }
 0x3c9   : > { %v688_v56 = vadd.f32 1e-05, %v686_v55 }
 0x3cb   : > { %1042 = vrsqrt.f32 %v688_v56 }
 0x3d5   : > { %v1043_v58 = vpop.eup %1042 }
 0x3d6   : > { %v690_v59 = vmul.f32 %v1043_v58, %v687_v57 }
 0x3d8   : > { %691 = vst [vmem:[%s337_s15] sm:$0xff] %v690_v59 }
 0x3d9   : > { %1171 = shalt.err (!%p1168_p4)
}
 0x3da   : > { %s1172_s8 = scalar_lea.hbm %s1545_s21, 128  ;;  %s1176_s14 = scalar_lea.hbm %s1596_s7, 256 }
 0x3db   : > { %p1173_p0 = scmp.ne.s32.totalorder %s1545_s21, %s1172_s8  ;;  %p1177_p8 = scmp.lt.u32.totalorder %s1545_s21, %s1596_s7 }
 0x3dc   : > { %p1178_p13 = scmp.lt.u32.totalorder %s1176_s14, %s1172_s8  ;;  %p1180_p10 = scmp.lt.u32.totalorder %s1172_s8, %s1545_s21 }
 0x3dd   : > { %p1174_p9 = pnand %p1173_p0, %p1437_p5 }
 0x3de   : > { %p1179_p6 = por %p1178_p13, %p1177_p8 }
 0x3df   : > { %p1175_p11 = pneg %p1174_p9 }
 0x3e0   : > { %p1181_p3 = por %p1180_p10, %p1179_p6 }
 0x3e2   : > { %p1182_p7 = pnand %p1181_p3, %p1175_p11 }
 0x3e4   : > { %1185 = shalt.err (!%p1182_p7)
}
 0x3e5   : > { %951 = dma.vmem_to_hbm [thread:$0]  (%p1437_p5), %s1547_s29, 128, %s1545_s21, %s693_s16  }
 0x3e6 PF: > { %s1616_s15 = sld [smem:[#allocation15_spill]]  ;;  %s718_s12 = sand.u32 1, %s1220_s24  }
 0x3e7   : > { %p1618_p1 = scmp.ge.s32.totalorder %s1232_s27, 2  ;;  %s719_s17 = scalar_lea.sflag [#allocation4], %s718_s12 }
 0x3ec   : > { %p1617_p12 = scmp.ne.s32.totalorder %s1616_s15, 0 }
 0x3ee   : > { %p968_p2 = pnand %p1618_p1, %p1617_p12 }
 0x3f0   : > { %1215 = dma.done.wait (!%p968_p2), %s719_s17, 128  }
 0x3f1   : > { %1217 = vsyncadd (!%p968_p2), %s719_s17, 4294967168  ;;  %p22_p4 = scmp.ge.s32.totalorder %s1423_s22, 4   ;;  %s1619_s24 = smov %s1224_s25 }
 0x3f2   : > { %s1620_s25 = smov %s1228_s26  ;;  %s1621_s26 = smov %s1433_s18 }
 0x3f3   : > { %s1622_s27 = smov %s1423_s22  ;;  %24 = sbr.rel (!%p22_p4) target bundleno = 7 (0x7), region = 105 }
 0x3fa   :  { %724 = vsyncpa [#allocation3], 1 }
 0x3fb   :  { %726 = vsyncpa [#allocation3 + $0x1], 1 }
 0x3fc   :  { %727 = vsyncpa [#allocation6], 1 }
 0x3fd   :  { %728 = vsyncpa [#allocation9], 1 }
 0x3fe   :  { %729 = vsyncpa [#allocation4], 1 }
 0x3ff   :  { %731 = vsyncpa [#allocation4 + $0x1], 1 }

</bundles_post_ra>
